<compile_context>
chip_gen: v7x
topology: tpu7x:2x2x1
jax: 0.10.0
libtpu: 0.0.40
codegen_flags: <defaults>
</compile_context>

<pallas_src>
import math

import jax
import jax.numpy as jnp
from jax.experimental import pallas as pl
from jax.experimental.pallas import tpu as pltpu


_PER_STEP_VMEM_TARGET = 8 * 1024 * 1024   # input + all outputs for one grid step
_VMEM_LIMIT_BYTES = 40 * 1024 * 1024      # explicit scoped-VMEM limit (double-buffer headroom)
_SMALL_TENSOR_BYTES = 2 * 1024 * 1024     # below this, split == free view -> plain XLA slices
_MAX_FUSED_CHUNKS = 64                    # avoid unrolled-kernel compile blowup


# ----------------------------------------------------------------------------
# Tile selection
# ----------------------------------------------------------------------------
def _pick_row_tile(nrows, row_bytes):
    """Row tile for the column-split kernel: multiple of 8 (or full extent),
    sized to the per-step VMEM target, and >= 2 grid blocks when the row
    extent allows it (so v7x's second TensorCore gets work)."""
    if nrows <= 8:
        return nrows
    budget_rows = max(8, (_PER_STEP_VMEM_TARGET // max(1, row_bytes)) // 8 * 8)
    tr = max(8, min((nrows // 8) * 8, budget_rows))
    if tr >= nrows and nrows >= 16:      # keep grid >= 2 for megacore sharding
        tr = max(8, (nrows // 16) * 8)
    return tr


def _pick_col_tile(ncols, col_bytes):
    """Column tile for the row-split kernel: multiple of 128 (or full extent)."""
    if ncols <= 256:
        return ncols
    budget_cols = max(128, (_PER_STEP_VMEM_TARGET // max(1, col_bytes)) // 128 * 128)
    tc = min(ncols, budget_cols)
    if tc < ncols:
        tc = max(128, (tc // 128) * 128)
    elif ncols >= 1024 and (ncols // 2) % 128 == 0:   # grid >= 2 for megacore
        tc = ncols // 2
    return tc


# ----------------------------------------------------------------------------
# Fused split kernels (one pallas_call for ALL chunks)
# ----------------------------------------------------------------------------
def _fused_col_split(x2d, offs, widths):
    """Split the columns of a 2D array into chunks with a single pallas_call.

    Grid iterates over row tiles; each step reads one (tr, ncols) input tile
    once and writes every chunk's (tr, width) window from it.
    """
    nrows, ncols = x2d.shape
    itemsize = x2d.dtype.itemsize
    tr = _pick_row_tile(nrows, 2 * ncols * itemsize)
    grid = (pl.cdiv(nrows, tr),)

    def kernel(x_ref, *out_refs):
        # Statically unrolled copies: 128-aligned offsets are plain vreg moves,
        # unaligned ones pay an in-VMEM lane relayout (still read-once).
        for o_ref, off, w in zip(out_refs, offs, widths):
            o_ref[...] = x_ref[:, off:off + w]

    return pl.pallas_call(
        kernel,
        out_shape=tuple(jax.ShapeDtypeStruct((nrows, w), x2d.dtype) for w in widths),
        grid=grid,
        in_specs=[pl.BlockSpec((tr, ncols), lambda i: (i, 0))],
        out_specs=tuple(pl.BlockSpec((tr, w), lambda i: (i, 0)) for w in widths),
        compiler_params=pltpu.CompilerParams(
            dimension_semantics=("parallel",),
            vmem_limit_bytes=_VMEM_LIMIT_BYTES),
        cost_estimate=pl.CostEstimate(
            flops=0, transcendentals=0,
            bytes_accessed=2 * nrows * ncols * itemsize),
    )(x2d)


def _fused_row_split(x2d, offs, sizes):
    """Split the rows of a 2D array into chunks with a single pallas_call.

    Used when there are no leading (outer) dims, so chunks are contiguous row
    ranges and the trailing `inner` axis stays lane-dense.
    """
    nrows, ncols = x2d.shape
    itemsize = x2d.dtype.itemsize
    tc = _pick_col_tile(ncols, 2 * nrows * itemsize)
    grid = (pl.cdiv(ncols, tc),)

    def kernel(x_ref, *out_refs):
        for o_ref, off, s in zip(out_refs, offs, sizes):
            o_ref[...] = x_ref[off:off + s, :]

    return pl.pallas_call(
        kernel,
        out_shape=tuple(jax.ShapeDtypeStruct((s, ncols), x2d.dtype) for s in sizes),
        grid=grid,
        in_specs=[pl.BlockSpec((nrows, tc), lambda j: (0, j))],
        out_specs=tuple(pl.BlockSpec((s, tc), lambda j: (0, j)) for s in sizes),
        compiler_params=pltpu.CompilerParams(
            dimension_semantics=("parallel",),
            vmem_limit_bytes=_VMEM_LIMIT_BYTES),
        cost_estimate=pl.CostEstimate(
            flops=0, transcendentals=0,
            bytes_accessed=2 * nrows * ncols * itemsize),
    )(x2d)


# ----------------------------------------------------------------------------
# Wrapper with torch.split semantics
# ----------------------------------------------------------------------------
def _split_sizes(total, split_size):
    if isinstance(split_size, (list, tuple)):
        sizes = [int(s) for s in split_size]
        if any(s < 0 for s in sizes):
            raise ValueError("split sections must be non-negative")
        if sum(sizes) != total:
            raise ValueError(
                f"split sections {sizes} do not sum to dimension size {total}")
        return sizes
    split_size = int(split_size)
    if split_size <= 0:
        raise ValueError("split_size must be a positive integer")
    return [min(split_size, total - off) for off in range(0, total, split_size)]


def pallas_split(x, split_size, dim, *, min_pallas_bytes=_SMALL_TENSOR_BYTES):
    """Equivalent of torch.split(x, split_size, dim); returns a tuple of arrays."""
    ndim = x.ndim
    dim = dim + ndim if dim < 0 else dim
    if not 0 <= dim < ndim:
        raise ValueError(f"dim {dim} out of range for rank-{ndim} input")
    total = x.shape[dim]
    sizes = _split_sizes(total, split_size)
    if len(sizes) == 1 and sizes[0] == total:
        return (x,)

    offs, off = [], 0
    for s in sizes:
        offs.append(off)
        off += s

    def _lax_path():
        return tuple(jax.lax.slice_in_dim(x, o, o + s, axis=dim)
                     for o, s in zip(offs, sizes))

    nbytes = x.size * x.dtype.itemsize
    # torch.split is a view op: for the small tensors this RL module sees,
    # zero-size sections, or huge chunk counts, plain XLA slices win.
    if (nbytes <= min_pallas_bytes
            or len(sizes) > _MAX_FUSED_CHUNKS
            or any(s == 0 for s in sizes)):
        return _lax_path()

    outer = math.prod(x.shape[:dim])
    inner = math.prod(x.shape[dim + 1:])
    chunk_shapes = [x.shape[:dim] + (s,) + x.shape[dim + 1:] for s in sizes]

    if outer == 1:
        # Row-split view keeps the split axis on sublanes / `inner` on lanes.
        x2d = x.reshape(total, inner)
        outs2d = _fused_row_split(x2d, offs, sizes)
    else:
        # Lane-dense column-split view: rows x (split_dim * trailing).
        x2d = x.reshape(outer, total * inner)
        outs2d = _fused_col_split(
            x2d, [o * inner for o in offs], [s * inner for s in sizes])

    return tuple(o.reshape(shape) for o, shape in zip(outs2d, chunk_shapes))


# ----------------------------------------------------------------------------
# Reference + tests
# ----------------------------------------------------------------------------
def _ref_split(x, split_size, dim):
    dim = dim % x.ndim
    sizes = _split_sizes(x.shape[dim], split_size)
    outs, off = [], 0
    for s in sizes:
        outs.append(jax.lax.slice_in_dim(x, off, off + s, axis=dim))
        off += s
    return tuple(outs)


if __name__ == "__main__":
    key = jax.random.PRNGKey(0)
    k_small, k_big, k_mat = jax.random.split(key, 3)

    def check(outs, refs):
        assert len(outs) == len(refs)
        for o, r in zip(outs, refs):
            assert o.shape == r.shape and o.dtype == r.dtype
            assert jnp.array_equal(o, r)

    # Small NCHW tensor consistent with the RL conv stack -> XLA view path.
    x_small = jax.random.normal(k_small, (2, 4, 16, 16), dtype=jnp.float32)
    small_cases = [(2, 1), (3, 1), ((1, 3), 1), (8, -1)]
    for ss, d in small_cases:
        outs = jax.block_until_ready(pallas_split(x_small, ss, d))
        check(outs, _ref_split(x_small, ss, d))

    # Larger tensor forced through the fused Pallas kernel (column-split view).
    x_big = jax.random.normal(k_big, (8, 8, 32, 32), dtype=jnp.float32)
    big_cases = [
        (4, 1),   # channel split: lane-aligned chunk windows
        (3, 1),   # ragged channel split (3, 3, 2)
        (8, 3),   # split last 32-wide axis: sub-128-lane chunk widths
    ]
    for ss, d in big_cases:
        outs = jax.block_until_ready(pallas_split(x_big, ss, d, min_pallas_bytes=0))
        check(outs, _ref_split(x_big, ss, d))

    # outer == 1: dim-0 split of a matrix -> fused row-split kernel.
    x_mat = jax.random.normal(k_mat, (64, 128), dtype=jnp.float32)
    outs = jax.block_until_ready(pallas_split(x_mat, 24, 0, min_pallas_bytes=0))
    check(outs, _ref_split(x_mat, 24, 0))

    print("KERNEL_OK")
</pallas_src>

<mosaic_0001>
module attributes {stable_mosaic.version = 11 : i64} {
  func.func @kernel(%arg0: i32, %arg1: memref<8x8192xf32, #tpu.memory_space<vmem>>, %arg2: memref<8x4096xf32, #tpu.memory_space<vmem>>, %arg3: memref<8x4096xf32, #tpu.memory_space<vmem>>) attributes {dimension_semantics = [#tpu.dimension_semantics<parallel>], iteration_bounds = array<i64: 1>, scalar_prefetch = 0 : i64, scratch_operands = 0 : i64, tpu.core_type = #tpu.core_type<tc>, window_params = [{transform_indices = @transform_0, window_bounds = array<i64: 8, 8192>}, {transform_indices = @transform_1, window_bounds = array<i64: 8, 4096>}, {transform_indices = @transform_2, window_bounds = array<i64: 8, 4096>}]} {
    %c0 = arith.constant 0 : index
    %c0_0 = arith.constant 0 : index
    %0 = vector.load %arg1[%c0, %c0_0] : memref<8x8192xf32, #tpu.memory_space<vmem>>, vector<8x4096xf32>
    %c0_1 = arith.constant 0 : index
    %c0_2 = arith.constant 0 : index
    %1 = vector.load %arg2[%c0_1, %c0_2] : memref<8x4096xf32, #tpu.memory_space<vmem>>, vector<8x4096xf32>
    tpu.vector_store %arg2[%c0_1, %c0_2], %0 {strides = array<i32>} : memref<8x4096xf32, #tpu.memory_space<vmem>>, vector<8x4096xf32>,
    %c0_3 = arith.constant 0 : index
    %c4096 = arith.constant 4096 : index
    %2 = vector.load %arg1[%c0_3, %c4096] : memref<8x8192xf32, #tpu.memory_space<vmem>>, vector<8x4096xf32>
    %c0_4 = arith.constant 0 : index
    %c0_5 = arith.constant 0 : index
    %3 = vector.load %arg3[%c0_4, %c0_5] : memref<8x4096xf32, #tpu.memory_space<vmem>>, vector<8x4096xf32>
    tpu.vector_store %arg3[%c0_4, %c0_5], %2 {strides = array<i32>} : memref<8x4096xf32, #tpu.memory_space<vmem>>, vector<8x4096xf32>,
    return
  }
  func.func @transform_0(%arg0: i32) -> (i32, i32) {
    %c0_i32 = arith.constant 0 : i32
    %c0_i32_0 = arith.constant 0 : i32
    return %arg0, %c0_i32 : i32, i32
  }
  func.func @transform_1(%arg0: i32) -> (i32, i32) {
    %c0_i32 = arith.constant 0 : i32
    %c0_i32_0 = arith.constant 0 : i32
    return %arg0, %c0_i32 : i32, i32
  }
  func.func @transform_2(%arg0: i32) -> (i32, i32) {
    %c0_i32 = arith.constant 0 : i32
    %c0_i32_0 = arith.constant 0 : i32
    return %arg0, %c0_i32 : i32, i32
  }
}

</mosaic_0001>

<bundles_post_ra>
// kernel: tpu_custom_call.1
= control target key start
LH: loop header
LB: loop body
LE: loop exit
PB: predicated region body
PF: predicated region fallthrough
CT: control target
= control target key end

     0   :  { %8 = vsyncpa [#allocation3], 0  ;;  %s317_s0 = inlined_call_operand.hbm [shape: f32[8,8192], index: 0, kind: input, shape index: {}]   ;;  %s318_s1 = inlined_call_operand.hbm [shape: f32[8,4096], index: 1, kind: output, shape index: {0}]   ;;  %s319_s2 = inlined_call_operand.hbm [shape: f32[8,4096], index: 2, kind: output, shape index: {1}]  }
   0x1   :  { %9 = vsyncpa [#allocation4], 0 }
   0x2   :  { %10 = vsyncpa [#allocation7], 0  ;;  %s256_s9 = smov [#allocation2]   ;;  %s184_s13 = scalar_lea.hbm %s317_s0, 8192 }
   0x3   :  { %s17_s10 = sshll.u32 %s256_s9, 4  ;;  %p185_p0 = scmp.ne.s32.totalorder %s317_s0, %s184_s13  ;;  %s18_s10 = int_to_ptr.vmem [resolvable:$true] %s17_s10 }
   0x4   :  { %p188_p1 = scmp.lt.u32.totalorder %s184_s13, %s317_s0 }
   0x6   :  { %p190_p2 = pnand %p188_p1, %p185_p0 }
   0x8   :  { %193 = shalt.err (!%p190_p2)
}
   0x9   :  { %s194_s18 = scalar_lea.vmem %s18_s10, 8192  ;;  %p199_p4 = scmp.lt.s32.totalorder %s18_s10, %s18_s10 }
   0xa   :  { %p195_p3 = scmp.ne.s32.totalorder %s18_s10, %s194_s18  ;;  %p200_p5 = scmp.lt.s32.totalorder %s194_s18, %s194_s18 }
   0xc   :  { %p201_p6 = por %p200_p5, %p199_p4 }
   0xe   :  { %p202_p7 = pnand %p201_p6, %p195_p3 }
  0x10   :  { %205 = shalt.err (!%p202_p7)
}
  0x11   :  { %20 = dma.hbm_to_vmem [thread:$0]  %s317_s0, 8192, %s18_s10, [#allocation3]  }
  0x12   :  { %250 = dma.done.wait [#allocation3], 8192  }
  0x13   :  { %251 = vsyncadd [#allocation3], 4294959104  ;;  %v24_v0 = vld [vmem:[#allocation2] sm:$0xff]  ;;  %v25_v1 = vld [vmem:[#allocation2 + $0x8] sm:$0xff]  ;;  %s257_s0 = smov [#allocation5]  }
  0x14   :  { %v26_v2 = vld [vmem:[#allocation2 + $0x10] sm:$0xff]  ;;  %56 = vst [vmem:[#allocation5] sm:$0xff] %v24_v0  ;;  %57 = vst [vmem:[#allocation5 + $0x8] sm:$0xff] %v25_v1  ;;  %v27_v3 = vld [vmem:[#allocation2 + $0x18] sm:$0xff]  ;;  %s158_s21 = sshll.u32 %s257_s0, 4  ;;  %s286_s21 = int_to_ptr.vmem [resolvable:$true] %s158_s21 }
  0x15   :  { %58 = vst [vmem:[#allocation5 + $0x10] sm:$0xff] %v26_v2  ;;  %v28_v4 = vld [vmem:[#allocation2 + $0x20] sm:$0xff]  ;;  %v29_v5 = vld [vmem:[#allocation2 + $0x28] sm:$0xff]  ;;  %59 = vst [vmem:[#allocation5 + $0x18] sm:$0xff] %v27_v3  ;;  %s206_s22 = scalar_lea.vmem %s286_s21, 4096  ;;  %p211_p9 = scmp.lt.s32.totalorder %s286_s21, %s286_s21 }
  0x16   :  { %60 = vst [vmem:[#allocation5 + $0x20] sm:$0xff] %v28_v4  ;;  %61 = vst [vmem:[#allocation5 + $0x28] sm:$0xff] %v29_v5  ;;  %v30_v6 = vld [vmem:[#allocation2 + $0x30] sm:$0xff]  ;;  %v31_v7 = vld [vmem:[#allocation2 + $0x38] sm:$0xff]  ;;  %p207_p8 = scmp.ne.s32.totalorder %s286_s21, %s206_s22  ;;  %p212_p10 = scmp.lt.s32.totalorder %s206_s22, %s206_s22 }
  0x17   :  { %v32_v8 = vld [vmem:[#allocation2 + $0x40] sm:$0xff]  ;;  %62 = vst [vmem:[#allocation5 + $0x30] sm:$0xff] %v30_v6  ;;  %63 = vst [vmem:[#allocation5 + $0x38] sm:$0xff] %v31_v7  ;;  %v33_v9 = vld [vmem:[#allocation2 + $0x48] sm:$0xff] }
  0x18   :  { %64 = vst [vmem:[#allocation5 + $0x40] sm:$0xff] %v32_v8  ;;  %v34_v10 = vld [vmem:[#allocation2 + $0x50] sm:$0xff]  ;;  %v35_v11 = vld [vmem:[#allocation2 + $0x58] sm:$0xff]  ;;  %65 = vst [vmem:[#allocation5 + $0x48] sm:$0xff] %v33_v9  ;;  %p213_p11 = por %p212_p10, %p211_p9 }
  0x19   :  { %66 = vst [vmem:[#allocation5 + $0x50] sm:$0xff] %v34_v10  ;;  %67 = vst [vmem:[#allocation5 + $0x58] sm:$0xff] %v35_v11  ;;  %v36_v12 = vld [vmem:[#allocation2 + $0x60] sm:$0xff]  ;;  %v37_v13 = vld [vmem:[#allocation2 + $0x68] sm:$0xff] }
  0x1a   :  { %v38_v14 = vld [vmem:[#allocation2 + $0x70] sm:$0xff]  ;;  %68 = vst [vmem:[#allocation5 + $0x60] sm:$0xff] %v36_v12  ;;  %69 = vst [vmem:[#allocation5 + $0x68] sm:$0xff] %v37_v13  ;;  %v39_v15 = vld [vmem:[#allocation2 + $0x78] sm:$0xff]  ;;  %p214_p12 = pnand %p213_p11, %p207_p8 }
  0x1b   :  { %70 = vst [vmem:[#allocation5 + $0x70] sm:$0xff] %v38_v14  ;;  %v40_v16 = vld [vmem:[#allocation2 + $0x80] sm:$0xff]  ;;  %v41_v17 = vld [vmem:[#allocation2 + $0x88] sm:$0xff]  ;;  %71 = vst [vmem:[#allocation5 + $0x78] sm:$0xff] %v39_v15 }
  0x1c   :  { %72 = vst [vmem:[#allocation5 + $0x80] sm:$0xff] %v40_v16  ;;  %73 = vst [vmem:[#allocation5 + $0x88] sm:$0xff] %v41_v17  ;;  %v42_v18 = vld [vmem:[#allocation2 + $0x90] sm:$0xff]  ;;  %v43_v19 = vld [vmem:[#allocation2 + $0x98] sm:$0xff] }
  0x1d   :  { %v44_v20 = vld [vmem:[#allocation2 + $0xa0] sm:$0xff]  ;;  %74 = vst [vmem:[#allocation5 + $0x90] sm:$0xff] %v42_v18  ;;  %75 = vst [vmem:[#allocation5 + $0x98] sm:$0xff] %v43_v19  ;;  %v45_v21 = vld [vmem:[#allocation2 + $0xa8] sm:$0xff] }
  0x1e   :  { %76 = vst [vmem:[#allocation5 + $0xa0] sm:$0xff] %v44_v20  ;;  %v46_v22 = vld [vmem:[#allocation2 + $0xb0] sm:$0xff]  ;;  %v47_v23 = vld [vmem:[#allocation2 + $0xb8] sm:$0xff]  ;;  %77 = vst [vmem:[#allocation5 + $0xa8] sm:$0xff] %v45_v21 }
  0x1f   :  { %78 = vst [vmem:[#allocation5 + $0xb0] sm:$0xff] %v46_v22  ;;  %79 = vst [vmem:[#allocation5 + $0xb8] sm:$0xff] %v47_v23  ;;  %v48_v24 = vld [vmem:[#allocation2 + $0xc0] sm:$0xff]  ;;  %v49_v25 = vld [vmem:[#allocation2 + $0xc8] sm:$0xff] }
  0x20   :  { %v50_v26 = vld [vmem:[#allocation2 + $0xd0] sm:$0xff]  ;;  %80 = vst [vmem:[#allocation5 + $0xc0] sm:$0xff] %v48_v24  ;;  %81 = vst [vmem:[#allocation5 + $0xc8] sm:$0xff] %v49_v25  ;;  %v51_v27 = vld [vmem:[#allocation2 + $0xd8] sm:$0xff] }
  0x21   :  { %82 = vst [vmem:[#allocation5 + $0xd0] sm:$0xff] %v50_v26  ;;  %v52_v28 = vld [vmem:[#allocation2 + $0xe0] sm:$0xff]  ;;  %v53_v29 = vld [vmem:[#allocation2 + $0xe8] sm:$0xff]  ;;  %83 = vst [vmem:[#allocation5 + $0xd8] sm:$0xff] %v51_v27 }
  0x22   :  { %84 = vst [vmem:[#allocation5 + $0xe0] sm:$0xff] %v52_v28  ;;  %85 = vst [vmem:[#allocation5 + $0xe8] sm:$0xff] %v53_v29  ;;  %v54_v30 = vld [vmem:[#allocation2 + $0xf0] sm:$0xff]  ;;  %v55_v31 = vld [vmem:[#allocation2 + $0xf8] sm:$0xff] }
  0x23   :  { %v88_v32 = vld [vmem:[#allocation2 + $0x100] sm:$0xff]  ;;  %86 = vst [vmem:[#allocation5 + $0xf0] sm:$0xff] %v54_v30  ;;  %87 = vst [vmem:[#allocation5 + $0xf8] sm:$0xff] %v55_v31  ;;  %v89_v33 = vld [vmem:[#allocation2 + $0x108] sm:$0xff] }
  0x24   :  { %120 = vst [vmem:[#allocation6] sm:$0xff] %v88_v32  ;;  %v90_v34 = vld [vmem:[#allocation2 + $0x110] sm:$0xff]  ;;  %v91_v35 = vld [vmem:[#allocation2 + $0x118] sm:$0xff]  ;;  %121 = vst [vmem:[#allocation6 + $0x8] sm:$0xff] %v89_v33 }
  0x25   :  { %122 = vst [vmem:[#allocation6 + $0x10] sm:$0xff] %v90_v34  ;;  %123 = vst [vmem:[#allocation6 + $0x18] sm:$0xff] %v91_v35  ;;  %v92_v36 = vld [vmem:[#allocation2 + $0x120] sm:$0xff]  ;;  %v93_v37 = vld [vmem:[#allocation2 + $0x128] sm:$0xff] }
  0x26   :  { %v94_v38 = vld [vmem:[#allocation2 + $0x130] sm:$0xff] }
  0x27   :  { %217 = shalt.err (!%p214_p12)
}
  0x28   :  { %s218_s25 = scalar_lea.hbm %s318_s1, 4096 }
  0x29   :  { %p219_p13 = scmp.ne.s32.totalorder %s318_s1, %s218_s25  ;;  %p222_p0 = scmp.lt.u32.totalorder %s218_s25, %s318_s1 }
  0x2b   :  { %p224_p1 = pnand %p222_p0, %p219_p13 }
  0x2d   :  { %227 = shalt.err (!%p224_p1)
}
  0x2e   :  { %161 = dma.vmem_to_hbm [thread:$0]  %s286_s21, 4096, %s318_s1, [#allocation4]   ;;  %124 = vst [vmem:[#allocation6 + $0x20] sm:$0xff] %v92_v36  ;;  %125 = vst [vmem:[#allocation6 + $0x28] sm:$0xff] %v93_v37  ;;  %v95_v39 = vld [vmem:[#allocation2 + $0x138] sm:$0xff]  ;;  %v96_v40 = vld [vmem:[#allocation2 + $0x140] sm:$0xff] }
  0x2f   :  { %126 = vst [vmem:[#allocation6 + $0x30] sm:$0xff] %v94_v38  ;;  %v97_v41 = vld [vmem:[#allocation2 + $0x148] sm:$0xff]  ;;  %127 = vst [vmem:[#allocation6 + $0x38] sm:$0xff] %v95_v39  ;;  %v98_v42 = vld [vmem:[#allocation2 + $0x150] sm:$0xff]  ;;  %s258_s1 = smov [#allocation6]  }
  0x30   :  { %128 = vst [vmem:[#allocation6 + $0x40] sm:$0xff] %v96_v40  ;;  %129 = vst [vmem:[#allocation6 + $0x48] sm:$0xff] %v97_v41  ;;  %v99_v43 = vld [vmem:[#allocation2 + $0x158] sm:$0xff]  ;;  %v100_v44 = vld [vmem:[#allocation2 + $0x160] sm:$0xff]  ;;  %s168_s4 = sshll.u32 %s258_s1, 4  ;;  %s169_s4 = int_to_ptr.vmem [resolvable:$true] %s168_s4 }
  0x31   :  { %130 = vst [vmem:[#allocation6 + $0x50] sm:$0xff] %v98_v42  ;;  %131 = vst [vmem:[#allocation6 + $0x58] sm:$0xff] %v99_v43  ;;  %v101_v45 = vld [vmem:[#allocation2 + $0x168] sm:$0xff]  ;;  %v102_v46 = vld [vmem:[#allocation2 + $0x170] sm:$0xff]  ;;  %s228_s5 = scalar_lea.vmem %s169_s4, 4096  ;;  %p233_p3 = scmp.lt.s32.totalorder %s169_s4, %s169_s4 }
  0x32   :  { %132 = vst [vmem:[#allocation6 + $0x60] sm:$0xff] %v100_v44  ;;  %v103_v47 = vld [vmem:[#allocation2 + $0x178] sm:$0xff]  ;;  %133 = vst [vmem:[#allocation6 + $0x68] sm:$0xff] %v101_v45  ;;  %v104_v48 = vld [vmem:[#allocation2 + $0x180] sm:$0xff]  ;;  %p229_p2 = scmp.ne.s32.totalorder %s169_s4, %s228_s5  ;;  %p234_p4 = scmp.lt.s32.totalorder %s228_s5, %s228_s5 }
  0x33   :  { %134 = vst [vmem:[#allocation6 + $0x70] sm:$0xff] %v102_v46  ;;  %135 = vst [vmem:[#allocation6 + $0x78] sm:$0xff] %v103_v47  ;;  %v105_v49 = vld [vmem:[#allocation2 + $0x188] sm:$0xff]  ;;  %v106_v50 = vld [vmem:[#allocation2 + $0x190] sm:$0xff] }
  0x34   :  { %136 = vst [vmem:[#allocation6 + $0x80] sm:$0xff] %v104_v48  ;;  %137 = vst [vmem:[#allocation6 + $0x88] sm:$0xff] %v105_v49  ;;  %v107_v51 = vld [vmem:[#allocation2 + $0x198] sm:$0xff]  ;;  %v108_v52 = vld [vmem:[#allocation2 + $0x1a0] sm:$0xff]  ;;  %p235_p5 = por %p234_p4, %p233_p3 }
  0x35   :  { %138 = vst [vmem:[#allocation6 + $0x90] sm:$0xff] %v106_v50  ;;  %v109_v53 = vld [vmem:[#allocation2 + $0x1a8] sm:$0xff]  ;;  %139 = vst [vmem:[#allocation6 + $0x98] sm:$0xff] %v107_v51  ;;  %v110_v54 = vld [vmem:[#allocation2 + $0x1b0] sm:$0xff] }
  0x36   :  { %140 = vst [vmem:[#allocation6 + $0xa0] sm:$0xff] %v108_v52  ;;  %141 = vst [vmem:[#allocation6 + $0xa8] sm:$0xff] %v109_v53  ;;  %v111_v55 = vld [vmem:[#allocation2 + $0x1b8] sm:$0xff]  ;;  %v112_v56 = vld [vmem:[#allocation2 + $0x1c0] sm:$0xff]  ;;  %p236_p6 = pnand %p235_p5, %p229_p2 }
  0x37   :  { %142 = vst [vmem:[#allocation6 + $0xb0] sm:$0xff] %v110_v54  ;;  %143 = vst [vmem:[#allocation6 + $0xb8] sm:$0xff] %v111_v55  ;;  %v113_v57 = vld [vmem:[#allocation2 + $0x1c8] sm:$0xff]  ;;  %v114_v58 = vld [vmem:[#allocation2 + $0x1d0] sm:$0xff] }
  0x38   :  { %144 = vst [vmem:[#allocation6 + $0xc0] sm:$0xff] %v112_v56  ;;  %v115_v59 = vld [vmem:[#allocation2 + $0x1d8] sm:$0xff]  ;;  %145 = vst [vmem:[#allocation6 + $0xc8] sm:$0xff] %v113_v57  ;;  %v116_v60 = vld [vmem:[#allocation2 + $0x1e0] sm:$0xff] }
  0x39   :  { %146 = vst [vmem:[#allocation6 + $0xd0] sm:$0xff] %v114_v58  ;;  %147 = vst [vmem:[#allocation6 + $0xd8] sm:$0xff] %v115_v59  ;;  %v117_v61 = vld [vmem:[#allocation2 + $0x1e8] sm:$0xff]  ;;  %v118_v62 = vld [vmem:[#allocation2 + $0x1f0] sm:$0xff] }
  0x3a   :  { %148 = vst [vmem:[#allocation6 + $0xe0] sm:$0xff] %v116_v60  ;;  %149 = vst [vmem:[#allocation6 + $0xe8] sm:$0xff] %v117_v61  ;;  %v119_v63 = vld [vmem:[#allocation2 + $0x1f8] sm:$0xff] }
  0x3b   :  { %150 = vst [vmem:[#allocation6 + $0xf0] sm:$0xff] %v118_v62  ;;  %151 = vst [vmem:[#allocation6 + $0xf8] sm:$0xff] %v119_v63 }
  0x3c   :  { %239 = shalt.err (!%p236_p6)
}
  0x3d   :  { %s240_s8 = scalar_lea.hbm %s319_s2, 4096 }
  0x3e   :  { %p241_p7 = scmp.ne.s32.totalorder %s319_s2, %s240_s8  ;;  %p244_p8 = scmp.lt.u32.totalorder %s240_s8, %s319_s2 }
  0x40   :  { %p246_p9 = pnand %p244_p8, %p241_p7 }
  0x42   :  { %249 = shalt.err (!%p246_p9)
}
  0x43   :  { %171 = dma.vmem_to_hbm [thread:$0]  %s169_s4, 4096, %s319_s2, [#allocation7]  }
  0x44   :  { %252 = dma.done.wait [#allocation4], 4096  }
  0x45   :  { %253 = vsyncadd [#allocation4], 4294963200 }
  0x46   :  { %254 = dma.done.wait [#allocation7], 4096  }
  0x47   :  { %255 = vsyncadd [#allocation7], 4294963200 }
  0x48   :  { %178 = vsyncpa [#allocation3], 1 }
  0x49   :  { %179 = vsyncpa [#allocation4], 1 }
  0x4a   :  { %180 = vsyncpa [#allocation7], 1 }

</bundles_post_ra>
